<compile_context>
chip_gen: v6e
topology: v6e:2x2x1
jax: 0.10.0
libtpu: 0.0.40
codegen_flags: <defaults>
</compile_context>

<pallas_src>
import functools

import jax
import jax.numpy as jnp
from jax.experimental import pallas as pl
from jax.experimental.pallas import tpu as pltpu


def _truncation_kernel(x_ref, avg_ref, o_ref, *, threshold):
    x = x_ref[...]            # (block_b, L)
    avg = avg_ref[...]        # (1, L) — broadcasts over the batch rows (VPU)
    # torch.lerp(start=avg, end=x, weight=threshold) = avg + threshold * (x - avg)
    o_ref[...] = (avg + threshold * (x - avg)).astype(o_ref.dtype)


@functools.partial(jax.jit, static_argnames=("threshold", "block_b"))
def truncation_forward(x, avg_latent, *, threshold=1.0, block_b=None):
    """x: (B, latent_size); avg_latent: (latent_size,); threshold: python scalar."""
    B, L = x.shape
    assert avg_latent.shape == (L,)
    if block_b is None:
        # Real batch tile (multiple of 8 sublanes) instead of block_b = B:
        # gives grid > 1 → DMA/compute overlap and megacore sharding on v7x.
        block_b = min(B, 128)
    grid = (pl.cdiv(B, block_b),)
    avg2 = avg_latent.reshape(1, L)

    kernel = functools.partial(_truncation_kernel, threshold=float(threshold))
    itemsize = jnp.dtype(x.dtype).itemsize
    cost = pl.CostEstimate(
        flops=3 * B * L,                                  # sub, mul, add per element
        transcendentals=0,
        bytes_accessed=(2 * B * L + L) * itemsize,        # x in, y out, avg in
    )

    return pl.pallas_call(
        kernel,
        out_shape=jax.ShapeDtypeStruct((B, L), x.dtype),
        grid_spec=pltpu.PrefetchScalarGridSpec(
            num_scalar_prefetch=0,
            grid=grid,
            in_specs=[
                pl.BlockSpec((block_b, L), lambda i: (i, 0)),   # batch-tiled x
                pl.BlockSpec((1, L), lambda i: (0, 0)),         # invariant avg_latent
            ],
            out_specs=pl.BlockSpec((block_b, L), lambda i: (i, 0)),
        ),
        compiler_params=pltpu.CompilerParams(
            dimension_semantics=("parallel",),
            vmem_limit_bytes=32 * 1024 * 1024,
        ),
        cost_estimate=cost,
    )(x, avg2)


def update_avg_latent(avg_latent, last_avg, *, beta=0.995, is_init=False):
    # Stateful EMA buffer maintenance from TruncationLayer.update(); this is an
    # O(latent_size) host-side state update, so plain JAX (no kernel needed).
    avg = jnp.where(is_init, last_avg, avg_latent)
    return beta * avg + (1.0 - beta) * last_avg


if __name__ == "__main__":
    key = jax.random.PRNGKey(0)
    kx, ka = jax.random.split(key)

    # Small but lane-dense shapes: latent_size multiple of 128, batch gives grid=(2,).
    batch, latent_size = 256, 256
    threshold = 0.7

    x = jax.random.normal(kx, (batch, latent_size), dtype=jnp.float32)
    avg_latent = jax.random.normal(ka, (latent_size,), dtype=jnp.float32)

    out = truncation_forward(x, avg_latent, threshold=threshold)
    jax.block_until_ready(out)

    # Reference: torch.lerp(avg, x, t) = avg + t * (x - avg)
    ref = avg_latent[None, :] + threshold * (x - avg_latent[None, :])
    assert out.shape == (batch, latent_size)
    assert jnp.allclose(out, ref, atol=1e-6, rtol=1e-6), "mismatch vs reference"

    print("KERNEL_OK")
</pallas_src>

<mosaic_0001>
module attributes {stable_mosaic.version = 11 : i64} {
  func.func @_truncation_kernel(%arg0: i32, %arg1: memref<128x256xf32, #tpu.memory_space<vmem>>, %arg2: memref<1x256xf32, #tpu.memory_space<vmem>>, %arg3: memref<128x256xf32, #tpu.memory_space<vmem>>) attributes {dimension_semantics = [#tpu.dimension_semantics<parallel>], iteration_bounds = array<i64: 2>, scalar_prefetch = 0 : i64, scratch_operands = 0 : i64, tpu.core_type = #tpu.core_type<tc>, window_params = [{transform_indices = @transform_0, window_bounds = array<i64: 128, 256>}, {pipeline_mode = #tpu.pipeline_mode<synchronous>, transform_indices = @transform_1, window_bounds = array<i64: 1, 256>}, {transform_indices = @transform_2, window_bounds = array<i64: 128, 256>}]} {
    %c0 = arith.constant 0 : index
    %c0_0 = arith.constant 0 : index
    %0 = vector.load %arg1[%c0, %c0_0] : memref<128x256xf32, #tpu.memory_space<vmem>>, vector<128x256xf32>
    %c0_1 = arith.constant 0 : index
    %c0_2 = arith.constant 0 : index
    %1 = vector.load %arg2[%c0_1, %c0_2] : memref<1x256xf32, #tpu.memory_space<vmem>>, vector<1x256xf32>
    %2 = vector.broadcast %1 : vector<1x256xf32> to vector<128x256xf32>
    %3 = arith.subf %0, %2 : vector<128x256xf32>
    %cst = arith.constant 0.699999988 : f32
    %4 = vector.broadcast %cst : f32 to vector<128x256xf32>
    %5 = arith.mulf %4, %3 : vector<128x256xf32>
    %6 = vector.broadcast %1 : vector<1x256xf32> to vector<128x256xf32>
    %7 = arith.addf %6, %5 : vector<128x256xf32>
    %c0_3 = arith.constant 0 : index
    %c0_4 = arith.constant 0 : index
    %8 = vector.load %arg3[%c0_3, %c0_4] : memref<128x256xf32, #tpu.memory_space<vmem>>, vector<128x256xf32>
    tpu.vector_store %arg3[%c0_3, %c0_4], %7 {strides = array<i32>} : memref<128x256xf32, #tpu.memory_space<vmem>>, vector<128x256xf32>,
    return
  }
  func.func @transform_0(%arg0: i32) -> (i32, i32) {
    %c0_i32 = arith.constant 0 : i32
    %c0_i32_0 = arith.constant 0 : i32
    return %arg0, %c0_i32 : i32, i32
  }
  func.func @transform_1(%arg0: i32) -> (i32, i32) {
    %c0_i32 = arith.constant 0 : i32
    %c0_i32_0 = arith.constant 0 : i32
    %c0_i32_1 = arith.constant 0 : i32
    return %c0_i32, %c0_i32_0 : i32, i32
  }
  func.func @transform_2(%arg0: i32) -> (i32, i32) {
    %c0_i32 = arith.constant 0 : i32
    %c0_i32_0 = arith.constant 0 : i32
    return %arg0, %c0_i32 : i32, i32
  }
}

</mosaic_0001>

<bundles_post_ra>
// kernel: truncation_forward.1
= control target key start
LH: loop header
LB: loop body
LE: loop exit
PB: predicated region body
PF: predicated region fallthrough
CT: control target
= control target key end

     0   :  { %7 = vsyncpa [#allocation3], 0  ;;  %s908_s0 = inlined_call_operand.hbm [shape: f32[256,256], index: 0, kind: input, shape index: {}]   ;;  %s909_s1 = inlined_call_operand.vmem [shape: f32[1,256], index: 1, kind: input, shape index: {}]   ;;  %s910_s2 = inlined_call_operand.hbm [shape: f32[256,256], index: 2, kind: output, shape index: {}]  }
   0x1   :  { %9 = vsyncpa [#allocation3 + $0x1], 0 }
   0x2   :  { %10 = vsyncpa [#allocation4], 0 }
   0x3   :  { %12 = vsyncpa [#allocation4 + $0x1], 0  ;;  %s610_s9 = smov 0   ;;  %s612_s10 = smov 0  }
   0x4   :  { %s614_s11 = smov 0   ;;  %s616_s12 = smov 0  }
   0x5 LB: > { %s631_s13 = sadd.s32 4294967295, %s587_s12   ;;  %s425_s14 = sadd.s32 4294967294, %s587_s12   ;;  %s587_s12 = sphi %s616_s12, %s925_s12   ;;  %s583_s11 = sphi %s614_s11, %s924_s11   ;;  %s579_s10 = sphi %s612_s10, %s923_s10   ;;  %s575_s9 = sphi %s610_s9, %s922_s9  }
   0x6   : > { %s635_s15 = sadd.s32 1, %s587_s12   ;;  %s25_s16 = sadd.s32 1, %s583_s11 }
   0x7   : > { %s22_s17 = ssub.s32 %s587_s12, %s635_s15  ;;  %p32_p0 = scmp.ne.s32.totalorder %s583_s11, %s579_s10 }
   0x8   : > { %p23_p1 = scmp.eq.s32.totalorder %s22_s17, 0  ;;  %p33_p2 = scmp.eq.s32.totalorder %s587_s12, 0 }
   0x9   : > { %p38_p3 = scmp.ne.s32.totalorder %s579_s10, %s575_s9  ;;  %p39_p4 = scmp.eq.s32.totalorder %s631_s13, 0 }
   0xa   : > { %s647_s18 = scalar_select %p23_p1, %s583_s11, %s25_s16  }
   0xb   : > { %p649_p5 = por %p33_p2, %p32_p0  ;;  %p653_p6 = por %p39_p4, %p38_p3 }
   0xc   : > { %p83_p7 = scmp.eq.s32.totalorder %s631_s13, 1  ;;  %p89_p8 = scmp.eq.s32.totalorder %s425_s14, 1 }
   0xd   : > { %s914_s20 = scalar_select %p653_p6, 1, 0 }
   0xe   : > { %p457_p10 = scmp.lt.s32.totalorder %s587_s12, 2  ;;  %p660_p11 = por %p83_p7, %p32_p0 }
   0xf   : > { %p664_p12 = por %p89_p8, %p38_p3  ;;  %s112_s23 = sand.u32 1, %s583_s11  }
  0x10   : > { %s915_s21 = scalar_select %p660_p11, 1, 0 }
  0x11   : > { %s916_s22 = scalar_select %p664_p12, 1, 0 }
  0x12   : > { %s442_s24 = sshll.u32 %s587_s12, 12  ;;  %s428_s25 = sshll.u32 %s112_s23, 8 }
  0x13   : > { %s673_s28 = scalar_lea.hbm %s908_s0, %s442_s24  ;;  %s116_s29 = scalar_lea.vmem [#allocation2], %s428_s25 }
  0x14   : > { %s124_s30 = sshll.u32 %s116_s29, 4  ;;  %p677_p13 = pnand %p457_p10, %p649_p5  ;;  %s681_s30 = int_to_ptr.vmem [resolvable:$true] %s124_s30 }
  0x15   : > { %s683_s4 = scalar_lea.sflag [#allocation3], %s112_s23  ;;  %s495_s5 = scalar_lea.hbm %s673_s28, 4096 }
  0x16   : > { %p496_p0 = scmp.ne.s32.totalorder %s673_s28, %s495_s5  ;;  %p497_p1 = pneg %p677_p13 }
  0x17   : > { %s500_s8 = scalar_lea.hbm %s908_s0, 8192  ;;  %p501_p4 = scmp.lt.s32.totalorder %s673_s28, %s908_s0 }
  0x18   : > { %p498_p2 = pnand %p497_p1, %p496_p0  ;;  %p502_p5 = scmp.lt.s32.totalorder %s500_s8, %s495_s5 }
  0x1a   : > { %p499_p3 = pneg %p498_p2  ;;  %p503_p7 = por %p502_p5, %p501_p4 }
  0x1c   : > { %p504_p8 = pnand %p503_p7, %p499_p3 }
  0x1e   : > { %507 = shalt.err (!%p504_p8)
}
  0x1f   : > { %s508_s17 = scalar_lea.vmem %s681_s30, 4096  ;;  %s589_s19 = smov [#allocation2]  }
  0x20   : > { %p509_p10 = scmp.ne.s32.totalorder %s681_s30, %s508_s17  ;;  %s513_s23 = sshll.u32 %s589_s19, 4  ;;  %s514_s23 = int_to_ptr.vmem [resolvable:$false] %s513_s23 }
  0x21   : > { %s515_s24 = scalar_lea.vmem %s514_s23, 8192  ;;  %p516_p2 = scmp.lt.s32.totalorder %s681_s30, %s514_s23 }
  0x22   : > { %p511_p9 = pnand %p509_p10, %p497_p1  ;;  %p517_p12 = scmp.lt.s32.totalorder %s515_s24, %s508_s17 }
  0x24   : > { %p512_p0 = pneg %p511_p9  ;;  %p518_p11 = por %p517_p12, %p516_p2 }
  0x26   : > { %p519_p6 = pnand %p518_p11, %p512_p0 }
  0x28   : > { %522 = shalt.err (!%p519_p6)
}
  0x29   : > { %s590_s25 = smov 256   ;;  %s591_s26 = smov 16  }
  0x2a   : > { %452 = dma.hbm_to_vmem [thread:$0]  (!%p677_p13), %s673_s28, 4096, %s681_s30, %s683_s4, %s590_s25, %s590_s25, %s591_s26  }
  0x2b   : > { %p432_p9 = scmp.ge.s32.totalorder %s587_s12, 1  ;;  %p132_p1 = scmp.lt.s32.totalorder %s587_s12, 3 }
  0x2d   : > { %p133_p3 = pnand %p432_p9, %p132_p1 }
  0x2e   : > { %s707_s27 = sand.u32 (!%p133_p3), 1, %s579_s10   ;;  %p918_p6 = scmp.ne.s32.totalorder (!%p133_p3), %s914_s20, 0 }
  0x2f   : > { %136 = sbr.rel (%p133_p3) target bundleno = 103 (0x67), region = 28  ;;  %s433_s29 = sshll.u32 (!%p133_p3), %s707_s27, 8 }
  0x30   : > { %s139_s5 = scalar_lea.sflag (!%p133_p3), [#allocation3], %s707_s27  ;;  %s713_s6 = scalar_lea.vmem (!%p133_p3), [#allocation2], %s433_s29 }
  0x34   : > { %566 = dma.done.wait (%p918_p6), %s139_s5, 4096  }
  0x35   : > { %568 = vsyncadd (%p918_p6), %s139_s5, 4294963200  ;;  %v199_v0 = vlaneseq  ;;  %v165_v4 = vld [vmem:[%s713_s6] sm:$0xff]  ;;  %v166_v6 = vld [vmem:[%s713_s6 + $0x8] sm:$0xff]  ;;  %s759_s20 = scalar_lea.vmem [#allocation5], %s433_s29  ;;  %s444_s3 = sshll.u32 %s631_s13, 12 }
  0x36   : > { %v197_v5 = vld [vmem:[%s909_s1] sm:$0x3]  ;;  %v167_v9 = vld [vmem:[%s713_s6 + $0x10] sm:$0xff]  ;;  %v168_v10 = vld [vmem:[%s713_s6 + $0x18] sm:$0xff]  ;;  %s352_s4 = sshll.u32 %s759_s20, 4  ;;  %s857_s8 = scalar_lea.hbm %s910_s2, %s444_s3  ;;  %s859_s4 = int_to_ptr.vmem [resolvable:$true] %s352_s4 }
  0x37   : > { %v200_v1 = vshrl.u32 %v199_v0, 7  ;;  %v169_v11 = vld [vmem:[%s713_s6 + $0x20] sm:$0xff]  ;;  %v170_v12 = vld [vmem:[%s713_s6 + $0x28] sm:$0xff]  ;;  %v171_v13 = vld [vmem:[%s713_s6 + $0x30] sm:$0xff]  ;;  %s338_s14 = scalar_lea.sflag [#allocation4], %s707_s27  ;;  %s523_s16 = scalar_lea.vmem %s859_s4, 4096 }
  0x38   : > { %v172_v14 = vld [vmem:[%s713_s6 + $0x38] sm:$0xff]  ;;  %v173_v19 = vld [vmem:[%s713_s6 + $0x40] sm:$0xff]  ;;  %v174_v20 = vld [vmem:[%s713_s6 + $0x48] sm:$0xff]  ;;  %p524_p11 = scmp.ne.s32.totalorder %s859_s4, %s523_s16  ;;  %p919_p12 = scmp.ne.s32.totalorder %s915_s21, 0 }
  0x39   : > { %v201_v2 = vsub.s32 0, %v200_v1  ;;  %v205_v3 = vsub.s32 1, %v200_v1  ;;  %v175_v25 = vld [vmem:[%s713_s6 + $0x50] sm:$0xff]  ;;  %v176_v38 = vld [vmem:[%s713_s6 + $0x58] sm:$0xff]  ;;  %v177_v39 = vld [vmem:[%s713_s6 + $0x60] sm:$0xff]  ;;  %s592_s17 = smov [#allocation5]  }
  0x3a   : > { %v178_v40 = vld [vmem:[%s713_s6 + $0x68] sm:$0xff]  ;;  %v179_v45 = vld [vmem:[%s713_s6 + $0x70] sm:$0xff]  ;;  %v180_v50 = vld [vmem:[%s713_s6 + $0x78] sm:$0xff]  ;;  %p525_p13 = pnand %p524_p11, %p919_p12  ;;  %s527_s19 = sshll.u32 %s592_s17, 4  ;;  %s528_s19 = int_to_ptr.vmem [resolvable:$false] %s527_s19 }
  0x3b   : > { %v724_v7 = vrot.slane %v197_v5, %v201_v2  ;;  %v726_v8 = vrot.slane %v197_v5, %v205_v3  ;;  %v181_v55 = vld [vmem:[%s713_s6 + $0x80] sm:$0xff]  ;;  %v182_v56 = vld [vmem:[%s713_s6 + $0x88] sm:$0xff]  ;;  %v183_v61 = vld [vmem:[%s713_s6 + $0x90] sm:$0xff]  ;;  %s529_s23 = scalar_lea.vmem %s528_s19, 8192  ;;  %p530_p5 = scmp.lt.s32.totalorder %s859_s4, %s528_s19 }
  0x3c   : > { %p526_p4 = pneg %p525_p13  ;;  %p531_p7 = scmp.lt.s32.totalorder %s529_s23, %s523_s16 }
  0x3d   : > { %v209_v15 = vsub.f32 %v165_v4, %v724_v7  ;;  %v210_v16 = vsub.f32 %v166_v6, %v726_v8  ;;  %v211_v17 = vsub.f32 %v167_v9, %v724_v7  ;;  %v212_v18 = vsub.f32 %v168_v10, %v726_v8  ;;  %v184_v6 = vld [vmem:[%s713_s6 + $0x98] sm:$0xff]  ;;  %v185_v9 = vld [vmem:[%s713_s6 + $0xa0] sm:$0xff]  ;;  %v186_v10 = vld [vmem:[%s713_s6 + $0xa8] sm:$0xff] }
  0x3e   : > { %v213_v21 = vsub.f32 %v169_v11, %v724_v7  ;;  %v214_v22 = vsub.f32 %v170_v12, %v726_v8  ;;  %v215_v23 = vsub.f32 %v171_v13, %v724_v7  ;;  %v216_v24 = vsub.f32 %v172_v14, %v726_v8  ;;  %p532_p8 = por %p531_p7, %p530_p5 }
  0x3f   : > { %v241_v26 = vmul.f32 0.7, %v209_v15  ;;  %v242_v27 = vmul.f32 0.7, %v210_v16  ;;  %v243_v28 = vmul.f32 0.7, %v211_v17  ;;  %v217_v29 = vsub.f32 %v173_v19, %v724_v7 }
  0x40   : > { %v244_v30 = vmul.f32 0.7, %v212_v18  ;;  %v245_v31 = vmul.f32 0.7, %v213_v21  ;;  %v246_v32 = vmul.f32 0.7, %v214_v22  ;;  %v218_v33 = vsub.f32 %v174_v20, %v726_v8  ;;  %p533_p10 = pnand %p532_p8, %p526_p4 }
  0x41   : > { %v273_v34 = vadd.f32 %v241_v26, %v724_v7  ;;  %v274_v35 = vadd.f32 %v242_v27, %v726_v8  ;;  %v275_v36 = vadd.f32 %v243_v28, %v724_v7  ;;  %v247_v37 = vmul.f32 0.7, %v215_v23  ;;  %v187_v15 = vld [vmem:[%s713_s6 + $0xb0] sm:$0xff]  ;;  %v188_v20 = vld [vmem:[%s713_s6 + $0xb8] sm:$0xff]  ;;  %v190_v26 = vld [vmem:[%s713_s6 + $0xc8] sm:$0xff] }
  0x42   : > { %v276_v41 = vadd.f32 %v244_v30, %v726_v8  ;;  %v277_v42 = vadd.f32 %v245_v31, %v724_v7  ;;  %v278_v43 = vadd.f32 %v246_v32, %v726_v8  ;;  %v248_v44 = vmul.f32 0.7, %v216_v24  ;;  %v191_v31 = vld [vmem:[%s713_s6 + $0xd0] sm:$0xff] }
  0x43   : > { %305 = vst [vmem:[%s759_s20] sm:$0xff] %v273_v34  ;;  %306 = vst [vmem:[%s759_s20 + $0x8] sm:$0xff] %v274_v35  ;;  %v279_v46 = vadd.f32 %v247_v37, %v724_v7  ;;  %v249_v47 = vmul.f32 0.7, %v217_v29  ;;  %v250_v48 = vmul.f32 0.7, %v218_v33  ;;  %v219_v49 = vsub.f32 %v175_v25, %v724_v7  ;;  %v189_v25 = vld [vmem:[%s713_s6 + $0xc0] sm:$0xff] }
  0x44   : > { %307 = vst [vmem:[%s759_s20 + $0x10] sm:$0xff] %v275_v36  ;;  %308 = vst [vmem:[%s759_s20 + $0x18] sm:$0xff] %v276_v41  ;;  %v280_v51 = vadd.f32 %v248_v44, %v726_v8  ;;  %v220_v52 = vsub.f32 %v176_v38, %v726_v8  ;;  %v221_v53 = vsub.f32 %v177_v39, %v724_v7  ;;  %v193_v41 = vld [vmem:[%s713_s6 + $0xe0] sm:$0xff] }
  0x45   : > { %309 = vst [vmem:[%s759_s20 + $0x20] sm:$0xff] %v277_v42  ;;  %310 = vst [vmem:[%s759_s20 + $0x28] sm:$0xff] %v278_v43  ;;  %v222_v54 = vsub.f32 %v178_v40, %v726_v8  ;;  %v281_v57 = vadd.f32 %v249_v47, %v724_v7  ;;  %v282_v58 = vadd.f32 %v250_v48, %v726_v8  ;;  %v251_v59 = vmul.f32 0.7, %v219_v49  ;;  %v192_v40 = vld [vmem:[%s713_s6 + $0xd8] sm:$0xff]  ;;  %v194_v42 = vld [vmem:[%s713_s6 + $0xe8] sm:$0xff] }
  0x46   : > { %311 = vst [vmem:[%s759_s20 + $0x30] sm:$0xff] %v279_v46  ;;  %v223_v60 = vsub.f32 %v179_v45, %v724_v7  ;;  %312 = vst [vmem:[%s759_s20 + $0x38] sm:$0xff] %v280_v51  ;;  %v252_v62 = vmul.f32 0.7, %v220_v52  ;;  %v253_v63 = vmul.f32 0.7, %v221_v53  ;;  %v224_v1 = vsub.f32 %v180_v50, %v726_v8 }
  0x47   : > { %v254_v0 = vmul.f32 0.7, %v222_v54  ;;  %313 = vst [vmem:[%s759_s20 + $0x40] sm:$0xff] %v281_v57  ;;  %314 = vst [vmem:[%s759_s20 + $0x48] sm:$0xff] %v282_v58  ;;  %v283_v2 = vadd.f32 %v251_v59, %v724_v7  ;;  %v225_v4 = vsub.f32 %v181_v55, %v724_v7  ;;  %v226_v5 = vsub.f32 %v182_v56, %v726_v8  ;;  %v195_v47 = vld [vmem:[%s713_s6 + $0xf0] sm:$0xff]  ;;  %v196_v52 = vld [vmem:[%s713_s6 + $0xf8] sm:$0xff] }
  0x48   : > { %v255_v3 = vmul.f32 0.7, %v223_v60  ;;  %v284_v11 = vadd.f32 %v252_v62, %v726_v8  ;;  %v285_v12 = vadd.f32 %v253_v63, %v724_v7  ;;  %v256_v14 = vmul.f32 0.7, %v224_v1 }
  0x49   : > { %v286_v13 = vadd.f32 %v254_v0, %v726_v8  ;;  %315 = vst [vmem:[%s759_s20 + $0x50] sm:$0xff] %v283_v2  ;;  %v257_v17 = vmul.f32 0.7, %v225_v4  ;;  %v258_v18 = vmul.f32 0.7, %v226_v5  ;;  %v227_v19 = vsub.f32 %v183_v61, %v724_v7 }
  0x4a   : > { %v287_v16 = vadd.f32 %v255_v3, %v724_v7  ;;  %316 = vst [vmem:[%s759_s20 + $0x58] sm:$0xff] %v284_v11  ;;  %317 = vst [vmem:[%s759_s20 + $0x60] sm:$0xff] %v285_v12  ;;  %v288_v21 = vadd.f32 %v256_v14, %v726_v8  ;;  %v228_v22 = vsub.f32 %v184_v6, %v726_v8 }
  0x4b   : > { %318 = vst [vmem:[%s759_s20 + $0x68] sm:$0xff] %v286_v13  ;;  %v229_v23 = vsub.f32 %v185_v9, %v724_v7  ;;  %v230_v24 = vsub.f32 %v186_v10, %v726_v8  ;;  %v289_v27 = vadd.f32 %v257_v17, %v724_v7  ;;  %v290_v28 = vadd.f32 %v258_v18, %v726_v8 }
  0x4c   : > { %319 = vst [vmem:[%s759_s20 + $0x70] sm:$0xff] %v287_v16  ;;  %v259_v29 = vmul.f32 0.7, %v227_v19  ;;  %v231_v30 = vsub.f32 %v187_v15, %v724_v7  ;;  %320 = vst [vmem:[%s759_s20 + $0x78] sm:$0xff] %v288_v21  ;;  %v260_v32 = vmul.f32 0.7, %v228_v22  ;;  %v232_v35 = vsub.f32 %v188_v20, %v726_v8 }
  0x4d   : > { %v261_v33 = vmul.f32 0.7, %v229_v23  ;;  %v262_v34 = vmul.f32 0.7, %v230_v24  ;;  %321 = vst [vmem:[%s759_s20 + $0x80] sm:$0xff] %v289_v27  ;;  %322 = vst [vmem:[%s759_s20 + $0x88] sm:$0xff] %v290_v28  ;;  %v233_v38 = vsub.f32 %v189_v25, %v724_v7  ;;  %v234_v39 = vsub.f32 %v190_v26, %v726_v8 }
  0x4e   : > { %v291_v36 = vadd.f32 %v259_v29, %v724_v7  ;;  %v263_v37 = vmul.f32 0.7, %v231_v30  ;;  %v292_v43 = vadd.f32 %v260_v32, %v726_v8  ;;  %v264_v46 = vmul.f32 0.7, %v232_v35 }
  0x4f   : > { %v293_v44 = vadd.f32 %v261_v33, %v724_v7  ;;  %v294_v45 = vadd.f32 %v262_v34, %v726_v8  ;;  %v265_v49 = vmul.f32 0.7, %v233_v38  ;;  %v266_v50 = vmul.f32 0.7, %v234_v39 }
  0x50   : > { %323 = vst [vmem:[%s759_s20 + $0x90] sm:$0xff] %v291_v36  ;;  %v295_v48 = vadd.f32 %v263_v37, %v724_v7  ;;  %v235_v51 = vsub.f32 %v191_v31, %v724_v7  ;;  %324 = vst [vmem:[%s759_s20 + $0x98] sm:$0xff] %v292_v43  ;;  %v296_v53 = vadd.f32 %v264_v46, %v726_v8 }
  0x51   : > { %325 = vst [vmem:[%s759_s20 + $0xa0] sm:$0xff] %v293_v44  ;;  %326 = vst [vmem:[%s759_s20 + $0xa8] sm:$0xff] %v294_v45  ;;  %v236_v54 = vsub.f32 %v192_v40, %v726_v8  ;;  %v237_v55 = vsub.f32 %v193_v41, %v724_v7  ;;  %v238_v56 = vsub.f32 %v194_v42, %v726_v8 }
  0x52   : > { %327 = vst [vmem:[%s759_s20 + $0xb0] sm:$0xff] %v295_v48  ;;  %v297_v57 = vadd.f32 %v265_v49, %v724_v7  ;;  %v298_v58 = vadd.f32 %v266_v50, %v726_v8  ;;  %v267_v59 = vmul.f32 0.7, %v235_v51  ;;  %v239_v60 = vsub.f32 %v195_v47, %v724_v7  ;;  %328 = vst [vmem:[%s759_s20 + $0xb8] sm:$0xff] %v296_v53 }
  0x53   : > { %v268_v61 = vmul.f32 0.7, %v236_v54  ;;  %v269_v62 = vmul.f32 0.7, %v237_v55  ;;  %v270_v63 = vmul.f32 0.7, %v238_v56  ;;  %v240_v0 = vsub.f32 %v196_v52, %v726_v8 }
  0x54   : > { %329 = vst [vmem:[%s759_s20 + $0xc0] sm:$0xff] %v297_v57  ;;  %330 = vst [vmem:[%s759_s20 + $0xc8] sm:$0xff] %v298_v58  ;;  %v299_v1 = vadd.f32 %v267_v59, %v724_v7  ;;  %v271_v2 = vmul.f32 0.7, %v239_v60 }
  0x55   : > { %v300_v3 = vadd.f32 %v268_v61, %v726_v8  ;;  %v301_v4 = vadd.f32 %v269_v62, %v724_v7  ;;  %v302_v5 = vadd.f32 %v270_v63, %v726_v8  ;;  %v272_v6 = vmul.f32 0.7, %v240_v0 }
  0x56   : > { %331 = vst [vmem:[%s759_s20 + $0xd0] sm:$0xff] %v299_v1  ;;  %v303_v9 = vadd.f32 %v271_v2, %v724_v7 }
  0x57   : > { %332 = vst [vmem:[%s759_s20 + $0xd8] sm:$0xff] %v300_v3  ;;  %333 = vst [vmem:[%s759_s20 + $0xe0] sm:$0xff] %v301_v4  ;;  %v304_v10 = vadd.f32 %v272_v6, %v726_v8 }
  0x58   : > { %334 = vst [vmem:[%s759_s20 + $0xe8] sm:$0xff] %v302_v5  ;;  %335 = vst [vmem:[%s759_s20 + $0xf0] sm:$0xff] %v303_v9 }
  0x59   : > { %336 = vst [vmem:[%s759_s20 + $0xf8] sm:$0xff] %v304_v10 }
  0x5a   : > { %536 = shalt.err (!%p533_p10)
}
  0x5b   : > { %s537_s24 = scalar_lea.hbm %s857_s8, 4096  ;;  %s541_s29 = scalar_lea.hbm %s910_s2, 8192 }
  0x5c   : > { %p538_p0 = scmp.ne.s32.totalorder %s857_s8, %s537_s24  ;;  %p542_p1 = scmp.lt.s32.totalorder %s857_s8, %s910_s2 }
  0x5d   : > { %p543_p3 = scmp.lt.s32.totalorder %s541_s29, %s537_s24 }
  0x5e   : > { %p539_p2 = pnand %p538_p0, %p919_p12 }
  0x5f   : > { %p544_p6 = por %p543_p3, %p542_p1 }
  0x60   : > { %p540_p9 = pneg %p539_p2 }
  0x62   : > { %p545_p11 = pnand %p544_p6, %p540_p9 }
  0x64   : > { %548 = shalt.err (!%p545_p11)
}
  0x65   : > { %s593_s28 = smov 256   ;;  %s594_s30 = smov 16  }
  0x66   : > { %447 = dma.vmem_to_hbm [thread:$0]  (%p919_p12), %s859_s4, 4096, %s857_s8, %s338_s14, %s593_s28, %s593_s28, %s594_s30  }
  0x67 PF: > { %s367_s20 = sand.u32 1, %s575_s9   ;;  %p920_p13 = scmp.ne.s32.totalorder %s916_s22, 0 }
  0x68   : > { %p921_p4 = scmp.ge.s32.totalorder %s587_s12, 2  ;;  %s368_s3 = scalar_lea.sflag [#allocation4], %s367_s20 }
  0x6a   : > { %p454_p5 = pnand %p921_p4, %p920_p13 }
  0x6c   : > { %p455_p7 = pneg %p454_p5 }
  0x6e   : > { %570 = dma.done.wait (%p455_p7), %s368_s3, 4096  }
  0x6f   : > { %572 = vsyncadd (%p455_p7), %s368_s3, 4294963200  ;;  %p15_p8 = scmp.ge.s32.totalorder %s635_s15, 4   ;;  %s922_s9 = smov %s579_s10 }
  0x70   : > { %s923_s10 = smov %s583_s11  ;;  %s924_s11 = smov %s647_s18 }
  0x71   : > { %s925_s12 = smov %s635_s15  ;;  %17 = sbr.rel (!%p15_p8) target bundleno = 5 (0x5), region = 73 }
  0x76   :  { %373 = vsyncpa [#allocation3], 1 }
  0x77   :  { %375 = vsyncpa [#allocation3 + $0x1], 1 }
  0x78   :  { %376 = vsyncpa [#allocation4], 1 }
  0x79   :  { %378 = vsyncpa [#allocation4 + $0x1], 1 }

</bundles_post_ra>
